<compile_context>
chip_gen: v7x
topology: tpu7x:2x2x1
jax: 0.10.0
libtpu: 0.0.40
codegen_flags: <defaults>
</compile_context>

<pallas_src>
import jax
import jax.numpy as jnp
from jax.experimental import pallas as pl
from jax.experimental.pallas import tpu as pltpu


# ~2 MiB per block: ~85% of HBM roofline in measured tiled-copy data, and the
# double-buffered in+out pipeline (~4x block ~= 8 MiB) fits every generation's
# *default* scoped-VMEM limit, so no vmem_limit_bytes is required by default.
DEFAULT_BLOCK_BYTES = 2 << 20
# If a caller raises target_block_bytes, never auto-raise scoped VMEM past this
# (v7x has only 64 MiB physical VMEM per TensorCore).
_MAX_AUTO_VMEM_LIMIT = 48 << 20


# ----------------------------- Pallas kernel ------------------------------- #

def _parallel_sparse_kernel(thr_ref, x_ref, o_ref):
    """One grid step: (TR, TL) tile of x, (TR, 1) per-row f32 thresholds."""
    x = x_ref[...]                                  # (TR, TL), x.dtype
    thr = thr_ref[...]                              # (TR, 1) f32 -> lane broadcast
    # Compare in f32 (thresholds stay f32 even for bf16 inputs), then apply the
    # mask with a multiply: x * mask matches PyTorch exactly (NaN propagation,
    # -0.0 on masked negatives), unlike jnp.where(mask, x, 0).
    mask = (x.astype(jnp.float32) > thr).astype(x.dtype)
    o_ref[...] = x * mask


# ----------------------------- tile selection ------------------------------- #

def _round_up(v, m):
    return (v + m - 1) // m * m


def _choose_tiles(r, l, itemsize, target_block_bytes, split_single_block):
    """Pick (tr, grid_r, tl, grid_l) so each block is ~target_block_bytes."""
    # --- lane (last) axis: take the full length whenever it fits the budget
    #     with the minimum 8 sublanes; otherwise tile it (128-aligned).
    if l * 8 * itemsize <= target_block_bytes:
        tl, grid_l = l, 1
    else:
        tl = max(128, (target_block_bytes // (8 * itemsize)) // 128 * 128)
        tl = min(tl, (l // 128) * 128)
        grid_l = pl.cdiv(l, tl)
    # --- row (sublane) axis: grow rows until the block reaches the budget.
    tr = max(8, (target_block_bytes // (tl * itemsize)) // 8 * 8)
    if tr >= r:
        tr, grid_r = r, 1
    else:
        grid_r = pl.cdiv(r, tr)
    # --- v7x megacore: a (1, 1) grid runs on a single TensorCore and sees only
    #     half the per-chip HBM bandwidth; split rows into >=2 parallel blocks.
    #     Harmless elsewhere (one extra ~0.35 us grid step).
    if split_single_block and grid_r * grid_l == 1 and r >= 16:
        tr = _round_up(pl.cdiv(r, 2), 8)
        grid_r = pl.cdiv(r, tr)
    return tr, grid_r, tl, grid_l


# ------------------------------- wrapper ------------------------------------ #

def build_per_channel_thresholds(num_channels_each, layer_thresholds):
    """Equivalent of ParallelSpatiallySparse.thresholds_numpy: each sub-layer's
    (scalar) threshold repeated over its channel count, concatenated."""
    parts = [
        jnp.full((nce,), float(t), dtype=jnp.float32)
        for nce, t in zip(num_channels_each, layer_thresholds)
    ]
    return jnp.concatenate(parts, axis=0)


def build_threshold_rows(per_channel_thresholds, batch):
    """(C,) f32 thresholds -> (N*C, 1) per-row f32 column.  Build ONCE per
    (batch, C) and reuse across forward calls (keeps the tile/reshape off the
    per-step hot path)."""
    thr = per_channel_thresholds.astype(jnp.float32).reshape(-1)
    return jnp.tile(thr, batch).reshape(batch * thr.shape[0], 1)


def parallel_spatially_sparse_forward(
    x,
    per_channel_thresholds=None,
    *,
    thr_rows=None,                       # precomputed (N*C, 1) f32 column (preferred)
    target_block_bytes=DEFAULT_BLOCK_BYTES,
    split_single_block=True,             # keep True for v7x (2 TensorCores)
    donate_input=False,                  # alias x -> output. Saves HBM *capacity*, not
                                         # bandwidth, and only when the surrounding
                                         # jax.jit actually donates x (donate_argnums);
                                         # never reuse x afterwards.
    vmem_limit_bytes=None,
):
    """
    x:                      (N, C, L) float32 / bfloat16
    per_channel_thresholds: (C,) f32 thresholds (thresholds_numpy output); ignored
                            if thr_rows is given.
    Returns (N, C, L), same dtype as x, with sub-threshold activations zeroed.
    """
    n, c, l = x.shape
    r = n * c
    x2 = x.reshape(r, l)                                    # free, contiguous

    if thr_rows is None:
        assert per_channel_thresholds is not None, "need thresholds"
        thr_rows = build_threshold_rows(per_channel_thresholds, n)
    assert thr_rows.shape == (r, 1)
    thr_rows = thr_rows.astype(jnp.float32)

    itemsize = jnp.dtype(x.dtype).itemsize
    tr, grid_r, tl, grid_l = _choose_tiles(
        r, l, itemsize, target_block_bytes, split_single_block)

    # Pipeline footprint: double-buffered input + output blocks + thr column.
    pipeline_bytes = 4 * tr * tl * itemsize + 2 * tr * 4
    if vmem_limit_bytes is None and pipeline_bytes > (12 << 20):
        # Caller asked for very large blocks: raise scoped VMEM, but keep
        # headroom inside v7x's 64 MiB-per-TensorCore physical VMEM.
        vmem_limit_bytes = min(int(pipeline_bytes) + (4 << 20), _MAX_AUTO_VMEM_LIMIT)

    extra_kwargs = {}
    if donate_input:
        extra_kwargs["input_output_aliases"] = {1: 0}       # x2 -> output

    out2 = pl.pallas_call(
        _parallel_sparse_kernel,
        out_shape=jax.ShapeDtypeStruct((r, l), x.dtype),
        grid_spec=pltpu.PrefetchScalarGridSpec(
            num_scalar_prefetch=0,
            # Length is the innermost grid axis: the thr block index (ri, 0) is
            # invariant between consecutive steps, so its DMA is not re-issued.
            grid=(grid_r, grid_l),
            in_specs=[
                pl.BlockSpec((tr, 1), lambda ri, li: (ri, 0)),      # thresholds
                pl.BlockSpec((tr, tl), lambda ri, li: (ri, li)),    # x tile
            ],
            out_specs=pl.BlockSpec((tr, tl), lambda ri, li: (ri, li)),
        ),
        compiler_params=pltpu.CompilerParams(
            dimension_semantics=("parallel", "parallel"),
            vmem_limit_bytes=vmem_limit_bytes,
        ),
        cost_estimate=pl.CostEstimate(
            flops=2 * r * l,                 # compare + multiply per element
            transcendentals=0,
            bytes_accessed=2 * r * l * itemsize + r * 4,
        ),
        **extra_kwargs,
    )(thr_rows, x2)
    return out2.reshape(n, c, l)


class ParallelSpatiallySparse:
    """Minimal JAX port of the module's forward (per-channel threshold mask).
    Caches the per-row threshold column per batch size so it is not rebuilt on
    every call."""

    def __init__(self, num_channels_each, layer_thresholds):
        self.num_channels_each = list(num_channels_each)
        self.num_channels = sum(num_channels_each)
        self.per_channel_thresholds = build_per_channel_thresholds(
            num_channels_each, layer_thresholds)
        self._thr_rows_cache = {}

    def __call__(self, x, **kwargs):
        n, c, _ = x.shape
        assert c == self.num_channels
        thr_rows = self._thr_rows_cache.get(n)
        if thr_rows is None:
            thr_rows = build_threshold_rows(self.per_channel_thresholds, n)
            self._thr_rows_cache[n] = thr_rows
        return parallel_spatially_sparse_forward(x, thr_rows=thr_rows, **kwargs)


# ------------------------------- reference ---------------------------------- #

def _reference(x, thr):
    """Pure-JAX reference: per-channel threshold mask (f32 compare, x*mask)."""
    mask = (x.astype(jnp.float32)
            > thr.astype(jnp.float32)[None, :, None]).astype(x.dtype)
    return x * mask


# ---------------------------------- main ----------------------------------- #

if __name__ == "__main__":
    # Module-consistent small shapes: batch=2, two sub sparse layers over
    # channel slices [3, 5] (num_channels = 8), sequence length 256.
    batch = 2
    num_channels_each = [3, 5]
    num_channels = sum(num_channels_each)
    seq_len = 256
    layer_thresholds = [0.5, 1.0]   # one scalar per SpatiallySparseAcrossChannels

    module = ParallelSpatiallySparse(num_channels_each, layer_thresholds)
    thr = module.per_channel_thresholds                      # (C,) f32

    key = jax.random.PRNGKey(0)

    # 1) f32, default byte-budget tiles. r=16 fits one block, but the megacore
    #    rule splits it into a (2, 1) grid so both v7x TensorCores get work.
    x = jax.random.normal(key, (batch, num_channels, seq_len), dtype=jnp.float32)
    y = jax.block_until_ready(module(x))
    assert y.shape == x.shape and y.dtype == x.dtype
    assert jnp.array_equal(y, _reference(x, thr)), "f32 mismatch vs reference"
    # second call reuses the cached per-row threshold column
    y2 = jax.block_until_ready(module(x))
    assert jnp.array_equal(y2, y)

    # 2a) Row-tail: batch=3 (r=24), small byte budget -> tr=16, grid_r=2 with a
    #     masked tail block on the row axis.
    x_rt = jax.random.normal(
        jax.random.PRNGKey(1), (3, num_channels, seq_len), dtype=jnp.float32)
    y_rt = jax.block_until_ready(
        parallel_spatially_sparse_forward(x_rt, thr, target_block_bytes=16 * 256 * 4))
    assert jnp.array_equal(y_rt, _reference(x_rt, thr)), "row-tail mismatch"

    # 2b) Lane-tail: L=400, small byte budget -> tl=256, grid_l=2 with a masked
    #     tail block on the length axis.
    x_lt = jax.random.normal(
        jax.random.PRNGKey(3), (batch, num_channels, 400), dtype=jnp.float32)
    y_lt = jax.block_until_ready(
        parallel_spatially_sparse_forward(x_lt, thr, target_block_bytes=8 * 256 * 4))
    assert jnp.array_equal(y_lt, _reference(x_lt, thr)), "lane-tail mismatch"

    # 3) bf16 I/O (half the HBM traffic); thresholds stay f32 inside the kernel.
    x_bf16 = jax.random.normal(
        jax.random.PRNGKey(2), (batch, num_channels, seq_len)).astype(jnp.bfloat16)
    y_bf16 = jax.block_until_ready(module(x_bf16))
    assert y_bf16.dtype == jnp.bfloat16
    assert jnp.array_equal(y_bf16, _reference(x_bf16, thr)), "bf16 mismatch"

    print("KERNEL_OK")
</pallas_src>

<mosaic_0001>
module attributes {stable_mosaic.version = 11 : i64} {
  func.func @_parallel_sparse_kernel(%arg0: i32, %arg1: i32, %arg2: memref<8x1xf32, #tpu.memory_space<vmem>>, %arg3: memref<8x256xf32, #tpu.memory_space<vmem>>, %arg4: memref<8x256xf32, #tpu.memory_space<vmem>>) attributes {dimension_semantics = [#tpu.dimension_semantics<parallel>, #tpu.dimension_semantics<parallel>], iteration_bounds = array<i64: 2, 1>, scalar_prefetch = 0 : i64, scratch_operands = 0 : i64, tpu.core_type = #tpu.core_type<tc>, window_params = [{transform_indices = @transform_0, window_bounds = array<i64: 8, 1>}, {transform_indices = @transform_1, window_bounds = array<i64: 8, 256>}, {transform_indices = @transform_2, window_bounds = array<i64: 8, 256>}]} {
    %c0 = arith.constant 0 : index
    %c0_0 = arith.constant 0 : index
    %0 = vector.load %arg3[%c0, %c0_0] : memref<8x256xf32, #tpu.memory_space<vmem>>, vector<8x256xf32>
    %c0_1 = arith.constant 0 : index
    %c0_2 = arith.constant 0 : index
    %1 = vector.load %arg2[%c0_1, %c0_2] : memref<8x1xf32, #tpu.memory_space<vmem>>, vector<8x1xf32>
    %2 = vector.broadcast %1 : vector<8x1xf32> to vector<8x256xf32>
    %3 = arith.cmpf ogt, %0, %2 : vector<8x256xf32>
    %4 = arith.extui %3 : vector<8x256xi1> to vector<8x256xi32>
    %5 = arith.sitofp %4 : vector<8x256xi32> to vector<8x256xf32>
    %6 = arith.mulf %0, %5 : vector<8x256xf32>
    %c0_3 = arith.constant 0 : index
    %c0_4 = arith.constant 0 : index
    %7 = vector.load %arg4[%c0_3, %c0_4] : memref<8x256xf32, #tpu.memory_space<vmem>>, vector<8x256xf32>
    tpu.vector_store %arg4[%c0_3, %c0_4], %6 {strides = array<i32>} : memref<8x256xf32, #tpu.memory_space<vmem>>, vector<8x256xf32>,
    return
  }
  func.func @transform_0(%arg0: i32, %arg1: i32) -> (i32, i32) {
    %c0_i32 = arith.constant 0 : i32
    %c0_i32_0 = arith.constant 0 : i32
    return %arg0, %c0_i32 : i32, i32
  }
  func.func @transform_1(%arg0: i32, %arg1: i32) -> (i32, i32) {
    %c0_i32 = arith.constant 0 : i32
    return %arg0, %arg1 : i32, i32
  }
  func.func @transform_2(%arg0: i32, %arg1: i32) -> (i32, i32) {
    %c0_i32 = arith.constant 0 : i32
    return %arg0, %arg1 : i32, i32
  }
}

</mosaic_0001>

<bundles_post_ra>
// kernel: tpu_custom_call.1
= control target key start
LH: loop header
LB: loop body
LE: loop exit
PB: predicated region body
PF: predicated region fallthrough
CT: control target
= control target key end

     0   :  { %7 = vsyncpa [#allocation3], 0  ;;  %s723_s0 = inlined_call_operand.vmem [shape: f32[16,1], index: 0, kind: input, shape index: {}]   ;;  %s724_s1 = inlined_call_operand.hbm [shape: f32[16,256], index: 1, kind: input, shape index: {}]   ;;  %s725_s2 = inlined_call_operand.hbm [shape: f32[16,256], index: 2, kind: output, shape index: {}]  }
   0x1   :  { %9 = vsyncpa [#allocation3 + $0x1], 0 }
   0x2   :  { %10 = vsyncpa [#allocation4], 0 }
   0x3   :  { %12 = vsyncpa [#allocation4 + $0x1], 0  ;;  %s546_s9 = smov 0   ;;  %s548_s10 = smov 0  }
   0x4   :  { %s550_s11 = smov 0   ;;  %s552_s12 = smov 0  }
   0x5   :  { %s554_s13 = smov 0   ;;  %s556_s14 = smov 0  }
   0x6 LB: > { %s328_s15 = sadd.s32 4294967295, %s525_s14   ;;  %s329_s16 = sadd.s32 4294967294, %s525_s14   ;;  %s525_s14 = sphi %s556_s14, %s18_s14   ;;  %s521_s13 = sphi %s554_s13, %s741_s13   ;;  %s517_s12 = sphi %s552_s12, %s740_s12   ;;  %s513_s11 = sphi %s550_s11, %s739_s11   ;;  %s509_s10 = sphi %s548_s10, %s738_s10   ;;  %s505_s9 = sphi %s546_s9, %s737_s9  }
   0x7   : > { %s30_s17 = sadd.s32 1, %s521_s13  ;;  %s65_s18 = sadd.s32 1, %s513_s11 }
   0x8   : > { %p32_p0 = scmp.ge.s32.totalorder %s30_s17, 2  ;;  %p72_p1 = scmp.ne.s32.totalorder %s513_s11, %s509_s10 }
   0x9   : > { %p73_p2 = scmp.eq.s32.totalorder %s525_s14, 0  ;;  %p78_p3 = scmp.ne.s32.totalorder %s509_s10, %s505_s9 }
   0xa   : > { %s743_s17 = smov (%p32_p0, %s30_s17), 0  ;;  %p79_p5 = scmp.eq.s32.totalorder %s328_s15, 0 }
   0xb   : > { %p587_p4 = por %p73_p2, %p72_p1  ;;  %s60_s20 = ssub.s32 %s521_s13, %s743_s17 }
   0xc   : > { %p104_p6 = scmp.eq.s32.totalorder %s328_s15, 1  ;;  %p63_p7 = scmp.eq.s32.totalorder %s60_s20, 0 }
   0xd   : > { %p593_p8 = por %p79_p5, %p78_p3  ;;  %p110_p10 = scmp.eq.s32.totalorder %s329_s16, 1 }
   0xe   : > { %p597_p9 = por %p104_p6, %p72_p1  ;;  %p360_p13 = scmp.lt.s32.totalorder %s525_s14, 2 }
   0xf   : > { %s602_s23 = scalar_select %p63_p7, %s513_s11, %s65_s18  }
  0x10   : > { %s729_s22 = scalar_select %p597_p9, 1, 0 }
  0x11   : > { %p604_p11 = por %p110_p10, %p78_p3  ;;  %s137_s25 = sand.u32 1, %s513_s11  }
  0x12   : > { %s332_s26 = sshll.u32 %s137_s25, 4  ;;  %s346_s27 = sshll.u32 %s521_s13, 8 }
  0x13   : > { %s730_s24 = scalar_select %p604_p11, 1, 0 }
  0x14   : > { %s615_s30 = scalar_lea.hbm %s724_s1, %s346_s27  ;;  %s141_s3 = scalar_lea.vmem [#allocation2], %s332_s26 }
  0x15   : > { %s151_s4 = sshll.u32 %s141_s3, 4  ;;  %p621_p0 = pnand %p360_p13, %p587_p4  ;;  %s617_s4 = int_to_ptr.vmem [resolvable:$true] %s151_s4 }
  0x16   : > { %s138_s6 = scalar_lea.sflag [#allocation3], %s137_s25  ;;  %s413_s7 = scalar_lea.hbm %s615_s30, 256 }
  0x17   : > { %p414_p3 = scmp.ne.s32.totalorder %s615_s30, %s413_s7  ;;  %p415_p5 = pneg %p621_p0 }
  0x18   : > { %s418_s16 = scalar_lea.hbm %s724_s1, 512  ;;  %p419_p4 = scmp.lt.u32.totalorder %s615_s30, %s724_s1 }
  0x19   : > { %p416_p6 = pnand %p415_p5, %p414_p3  ;;  %p420_p10 = scmp.lt.u32.totalorder %s418_s16, %s413_s7 }
  0x1a   : > { %p422_p12 = scmp.lt.u32.totalorder %s413_s7, %s615_s30 }
  0x1b   : > { %p417_p7 = pneg %p416_p6  ;;  %p421_p13 = por %p420_p10, %p419_p4 }
  0x1d   : > { %p423_p1 = por %p422_p12, %p421_p13 }
  0x1f   : > { %p424_p2 = pnand %p423_p1, %p417_p7 }
  0x21   : > { %427 = shalt.err (!%p424_p2)
}
  0x22   : > { %s428_s20 = scalar_lea.vmem %s617_s4, 256  ;;  %s527_s25 = smov [#allocation2]  }
  0x23   : > { %p429_p3 = scmp.ne.s32.totalorder %s617_s4, %s428_s20  ;;  %s433_s26 = sshll.u32 %s527_s25, 4  ;;  %s434_s26 = int_to_ptr.vmem [resolvable:$false] %s433_s26 }
  0x24   : > { %s435_s27 = scalar_lea.vmem %s434_s26, 512  ;;  %p436_p9 = scmp.lt.s32.totalorder %s617_s4, %s434_s26 }
  0x25   : > { %p431_p6 = pnand %p429_p3, %p415_p5  ;;  %p437_p4 = scmp.lt.s32.totalorder %s435_s27, %s428_s20 }
  0x27   : > { %p432_p11 = pneg %p431_p6  ;;  %p438_p10 = por %p437_p4, %p436_p9 }
  0x29   : > { %p439_p12 = pnand %p438_p10, %p432_p11 }
  0x2b   : > { %442 = shalt.err (!%p439_p12)
}
  0x2c   : > { %355 = dma.hbm_to_vmem [thread:$0]  (!%p621_p0), %s615_s30, 256, %s617_s4, %s138_s6  }
  0x2d   : > { %p732_p1 = scmp.lt.s32.totalorder %s525_s14, 3  ;;  %p733_p2 = scmp.ge.s32.totalorder %s525_s14, 1 }
  0x2f   : > { %p157_p5 = pnand %p733_p2, %p732_p1 }
  0x30   : > { %s657_s28 = sand.u32 (!%p157_p5), 1, %s509_s10  }
  0x31   : > { %160 = sbr.rel (%p157_p5) target bundleno = 210 (0xd2), region = 28  ;;  %s336_s29 = sshll.u32 (!%p157_p5), %s657_s28, 4 }
  0x32   : > { %s163_s3 = scalar_lea.sflag (!%p157_p5), [#allocation3], %s657_s28  ;;  %s166_s7 = scalar_lea.vmem (!%p157_p5), [#allocation2], %s336_s29 }
  0x38   : > { %496 = dma.done.wait (%p593_p8), %s163_s3, 256  }
  0x39   : > { %498 = vsyncadd (%p593_p8), %s163_s3, 4294967040  ;;  %p191_p9 = scmp.lt.s32.totalorder %s517_s12, 1  ;;  %v528_v0 = vmov 0   ;;  %v197_v2 = vld [vmem:[%s166_s7] sm:$0xff]  ;;  %v198_v3 = vld [vmem:[%s166_s7 + $0x8] sm:$0xff]  ;;  %s347_s21 = sshll.u32 %s517_s12, 8 }
  0x3a   : > { %412 = vset.pattern.permute.xlu0 %v528_v0  ;;  %s190_s15 = scalar_lea.vmem [#allocation5], %s336_s29  ;;  %v529_v5 = vmov 0.0   ;;  %s674_s20 = scalar_lea.hbm %s725_s2, %s347_s21 }
  0x3b   : > { %s192_s30 = scalar_select %p191_p9, %s517_s12, 1 }
  0x3c   : > { %s232_s16 = sshll.u32 %s190_s15, 4  ;;  %s216_s12 = scalar_lea.sflag [#allocation4], %s657_s28  ;;  %s676_s16 = int_to_ptr.vmem [resolvable:$true] %s232_s16 }
  0x3d   : > { %s338_s4 = sshll.u32 %s192_s30, 3  ;;  %s443_s25 = scalar_lea.vmem %s676_s16, 256 }
  0x3e   : > { %s194_s8 = scalar_lea.vmem %s723_s0, %s338_s4  ;;  %p444_p8 = scmp.ne.s32.totalorder %s676_s16, %s443_s25 }
  0x3f   : > { %v199_v1 = vld [vmem:[%s194_s8] sm:$0xff]  ;;  %p734_p11 = scmp.ne.s32.totalorder %s729_s22, 0  ;;  %s530_s26 = smov [#allocation5]  }
  0x40   : > { %202 = vperm.xlu0 %412, %v199_v1   ;;  %s447_s27 = sshll.u32 %s530_s26, 4  ;;  %s448_s27 = int_to_ptr.vmem [resolvable:$false] %s447_s27 }
  0x41   : > { %p445_p0 = pnand %p444_p8, %p734_p11  ;;  %s449_s29 = scalar_lea.vmem %s448_s27, 512 }
  0x42   : > { %p450_p13 = scmp.lt.s32.totalorder %s676_s16, %s448_s27  ;;  %p451_p3 = scmp.lt.s32.totalorder %s449_s29, %s443_s25 }
  0x43   : > { %p446_p7 = pneg %p445_p0 }
  0x44   : > { %p452_p6 = por %p451_p3, %p450_p13 }
  0x46   : > { %p453_p4 = pnand %p452_p6, %p446_p7 }
  0xbf   : > { %v203_v4 = vpop.permute.xlu0 %202 }
  0xc0   : > { %vm205_vm0 = vcmp.gt.f32.partialorder %v197_v2, %v203_v4  ;;  %vm206_vm1 = vcmp.gt.f32.partialorder %v198_v3, %v203_v4 }
  0xc1   : > { %v339_v6 = vsel %vm205_vm0, 1.0, %v529_v5  ;;  %v340_v7 = vsel %vm206_vm1, 1.0, %v529_v5 }
  0xc2   : > { %v211_v8 = vmul.f32 %v339_v6, %v197_v2  ;;  %v212_v9 = vmul.f32 %v340_v7, %v198_v3 }
  0xc4   : > { %213 = vst [vmem:[%s190_s15] sm:$0xff] %v211_v8  ;;  %214 = vst [vmem:[%s190_s15 + $0x8] sm:$0xff] %v212_v9 }
  0xc5   : > { %456 = shalt.err (!%p453_p4)
}
  0xc6   : > { %s457_s28 = scalar_lea.hbm %s674_s20, 256  ;;  %s461_s30 = scalar_lea.hbm %s725_s2, 512 }
  0xc7   : > { %p458_p10 = scmp.ne.s32.totalorder %s674_s20, %s457_s28  ;;  %p462_p2 = scmp.lt.u32.totalorder %s674_s20, %s725_s2 }
  0xc8   : > { %p463_p5 = scmp.lt.u32.totalorder %s461_s30, %s457_s28  ;;  %p465_p8 = scmp.lt.u32.totalorder %s457_s28, %s674_s20 }
  0xc9   : > { %p459_p12 = pnand %p458_p10, %p734_p11 }
  0xca   : > { %p464_p9 = por %p463_p5, %p462_p2 }
  0xcb   : > { %p460_p1 = pneg %p459_p12 }
  0xcc   : > { %p466_p0 = por %p465_p8, %p464_p9 }
  0xce   : > { %p467_p7 = pnand %p466_p0, %p460_p1 }
  0xd0   : > { %470 = shalt.err (!%p467_p7)
}
  0xd1   : > { %350 = dma.vmem_to_hbm [thread:$0]  (%p734_p11), %s676_s16, 256, %s674_s20, %s216_s12  }
  0xd2 PF: > { %s244_s6 = sand.u32 1, %s505_s9   ;;  %p735_p13 = scmp.ne.s32.totalorder %s730_s24, 0 }
  0xd3   : > { %p736_p3 = scmp.ge.s32.totalorder %s525_s14, 2  ;;  %s245_s8 = scalar_lea.sflag [#allocation4], %s244_s6 }
  0xd5   : > { %p357_p6 = pnand %p736_p3, %p735_p13 }
  0xd7   : > { %500 = dma.done.wait (!%p357_p6), %s245_s8, 256  }
  0xd8   : > { %502 = vsyncadd (!%p357_p6), %s245_s8, 4294967040  ;;  %s18_s14 = sadd.s32 1, %s525_s14   ;;  %s737_s9 = smov %s509_s10 }
  0xd9   : > { %p15_p4 = scmp.ge.s32.totalorder %s18_s14, 4   ;;  %s738_s10 = smov %s513_s11 }
  0xda   : > { %s739_s11 = smov %s602_s23  ;;  %s740_s12 = smov %s521_s13 }
  0xdb   : > { %s741_s13 = smov %s743_s17  ;;  %17 = sbr.rel (!%p15_p4) target bundleno = 6 (0x6), region = 76 }
  0xe2   :  { %250 = vsyncpa [#allocation3], 1 }
  0xe3   :  { %252 = vsyncpa [#allocation3 + $0x1], 1 }
  0xe4   :  { %253 = vsyncpa [#allocation4], 1 }
  0xe5   :  { %255 = vsyncpa [#allocation4 + $0x1], 1 }

</bundles_post_ra>
